<compile_context>
chip_gen: v6e
topology: v6e:2x2x1
jax: 0.10.0
libtpu: 0.0.40
codegen_flags: <defaults>
</compile_context>

<pallas_src>
import functools

import jax
import jax.numpy as jnp
from jax.experimental import pallas as pl
from jax.experimental.pallas import tpu as pltpu

_MIB = 1024 * 1024
_MATMUL_MIN_K = 9       # review: the tap loop saturates the XLU around k ~ 9-13
_MATMUL_MAX_L = 1024    # keep the resident (L, L) f32 averaging matrix small


def _round_up(x: int, m: int) -> int:
    return ((x + m - 1) // m) * m


def _vmem_budgets():
    """Per-generation (per-block byte budget, vmem_limit_bytes)."""
    try:
        vmem = int(pltpu.get_tpu_info().vmem_capacity_bytes)
    except Exception:  # detection unavailable -> conservative defaults
        vmem = 0
    if vmem >= 100 * _MIB:        # v5e / v6e: 128 MiB physical VMEM
        return 16 * _MIB, 64 * _MIB
    if vmem > 0:                  # v7x-class: 64 MiB per TensorCore
        return 8 * _MIB, 48 * _MIB
    return 6 * _MIB, 32 * _MIB    # unknown backend: stay conservative


def _averaging_matrix(L: int, kernel_size: int) -> jax.Array:
    """(L, L) banded averaging matrix with edge-replication weights folded in."""
    pad = (kernel_size - 1) // 2
    i = jnp.arange(L)[:, None]
    j = jnp.arange(L)[None, :]
    a = jnp.zeros((L, L), jnp.float32)
    for d in range(-pad, pad + 1):
        src = jnp.clip(i + d, 0, L - 1)
        a = a + (src == j).astype(jnp.float32)
    return a * (1.0 / kernel_size)


def _decomp_taps_kernel(x_ref, res_ref, trend_ref, *, kernel_size: int):
    """Small-k path. x_ref: (L, W) tile; rows = time, columns = series."""
    pad = (kernel_size - 1) // 2
    x = x_ref[...]
    L = x.shape[0]
    xf = x.astype(jnp.float32)

    # Slim edge fix-up temporaries: (1, W) rows and an (L, 1) row-index iota,
    # broadcast lazily inside jnp.where (no full (L, W) broadcast temps).
    first_row = xf[0:1, :]
    last_row = xf[L - 1:L, :]
    row = jax.lax.broadcasted_iota(jnp.int32, (L, 1), 0)

    # trend_i = (1/k) * sum_{d=-pad..pad} x[clamp(i+d, 0, L-1)].
    # Each tap: sublane rotate (XLU) + masked edge replication (VPU),
    # accumulated over a few independent f32 chains.
    n_acc = min(4, kernel_size)
    accs = [None] * n_acc
    for idx, d in enumerate(range(-pad, pad + 1)):
        if d == 0:
            term = xf
        else:
            term = pltpu.roll(xf, (-d) % L, axis=0)   # rolled[i] = x[(i+d) % L]
            if d > 0:
                term = jnp.where(row >= L - d, last_row, term)
            else:
                term = jnp.where(row < -d, first_row, term)
        a = idx % n_acc
        accs[a] = term if accs[a] is None else accs[a] + term

    total = accs[0]
    for a in accs[1:]:
        if a is not None:
            total = total + a
    trend = (total * (1.0 / kernel_size)).astype(trend_ref.dtype)
    trend_ref[...] = trend
    res_ref[...] = (xf - trend.astype(jnp.float32)).astype(res_ref.dtype)


def _decomp_matmul_kernel(a_ref, x_ref, res_ref, trend_ref):
    """Large-k path: trend = A @ x on the (otherwise idle) MXU."""
    xf = x_ref[...].astype(jnp.float32)
    trend_f32 = jnp.dot(a_ref[...], xf, preferred_element_type=jnp.float32)
    trend = trend_f32.astype(trend_ref.dtype)
    trend_ref[...] = trend
    res_ref[...] = (xf - trend.astype(jnp.float32)).astype(res_ref.dtype)


def series_decomp(x: jax.Array, kernel_size: int):
    """Returns (res, moving_mean), both shaped like x = (B, L, C)."""
    assert kernel_size >= 1 and kernel_size % 2 == 1, "odd kernel_size required"
    B, L, C = x.shape
    dtype = x.dtype
    itemsize = jnp.dtype(dtype).itemsize

    block_budget, vmem_limit = _vmem_budgets()
    # Rough per-element VMEM footprint across the pipeline: double-buffered
    # input, two double-buffered outputs, plus ~6 f32-sized live temporaries.
    per_elem = 6 * itemsize + 24

    use_matmul = (kernel_size >= _MATMUL_MIN_K) and (L <= _MATMUL_MAX_L)
    a_mat = _averaging_matrix(L, kernel_size) if use_matmul else None
    a_bytes = (L * L * 4 * 2) if use_matmul else 0   # double-buffered A

    # L is never tiled: guard against compile-time VMEM OOM for huge L.
    # TODO(synk): add an L-tiling path with a pad-row halo for very long series.
    assert L * 128 * per_elem + a_bytes <= int(0.85 * vmem_limit), (
        "series_decomp: sequence too long for a full-L block on this TPU; "
        "L-tiling with a halo is not implemented")

    # Largest lane tile (multiple of 128) fitting the per-block budget.
    max_tile = (block_budget // (L * per_elem)) // 128 * 128
    max_tile = int(max(128, min(max_tile, 4096)))

    if use_matmul:
        kernel = _decomp_matmul_kernel
    else:
        kernel = functools.partial(_decomp_taps_kernel, kernel_size=kernel_size)

    # ---------------- Path 1: native (B, L, C), zero wrapper copies ----------
    native = False
    c_tile = C
    if C % 128 == 0:
        native = True
        t = min(C, max_tile) // 128 * 128
        c_tile = 128
        while t >= 128:
            if C % t == 0:
                c_tile = t
                break
            t -= 128
    elif C >= 128 and (L * C * per_elem + a_bytes) <= int(0.7 * vmem_limit):
        native = True      # full-C block (legal: equals full dim), mostly lane-dense
        c_tile = C

    if native:
        x_spec = pl.BlockSpec((None, L, c_tile), lambda b, j: (b, 0, j))
        out_spec = pl.BlockSpec((None, L, c_tile), lambda b, j: (b, 0, j))
        if use_matmul:
            in_specs = [pl.BlockSpec((L, L), lambda b, j: (0, 0)), x_spec]
            args = (a_mat, x)
        else:
            in_specs = [x_spec]
            args = (x,)
        res, trend = pl.pallas_call(
            kernel,
            out_shape=(jax.ShapeDtypeStruct((B, L, C), dtype),
                       jax.ShapeDtypeStruct((B, L, C), dtype)),
            grid=(B, C // c_tile),
            in_specs=in_specs,
            out_specs=[out_spec, out_spec],
            compiler_params=pltpu.CompilerParams(
                dimension_semantics=("parallel", "parallel"),
                vmem_limit_bytes=vmem_limit),
        )(*args)
        return res, trend

    # ------------- Path 2: small / unaligned C -> fold (B*C) onto lanes ------
    N = B * C
    xt = jnp.transpose(x, (1, 0, 2)).reshape(L, N)

    n128 = _round_up(N, 128)
    lane_tile = min(max_tile, n128)
    # Guarantee >= 2 grid steps where possible so both v7x TensorCores get work.
    if n128 <= lane_tile and n128 >= 256:
        lane_tile = _round_up(n128 // 2, 128)
    Np = _round_up(N, lane_tile)
    if Np != N:
        xt = jnp.pad(xt, ((0, 0), (0, Np - N)))

    x_spec = pl.BlockSpec((L, lane_tile), lambda j: (0, j))
    out_spec = pl.BlockSpec((L, lane_tile), lambda j: (0, j))
    if use_matmul:
        in_specs = [pl.BlockSpec((L, L), lambda j: (0, 0)), x_spec]
        args = (a_mat, xt)
    else:
        in_specs = [x_spec]
        args = (xt,)

    res_p, trend_p = pl.pallas_call(
        kernel,
        out_shape=(jax.ShapeDtypeStruct((L, Np), dtype),
                   jax.ShapeDtypeStruct((L, Np), dtype)),
        grid=(Np // lane_tile,),
        in_specs=in_specs,
        out_specs=[out_spec, out_spec],
        compiler_params=pltpu.CompilerParams(
            dimension_semantics=("parallel",),
            vmem_limit_bytes=vmem_limit),
    )(*args)

    def _unfold(y):
        return jnp.transpose(y[:, :N].reshape(L, B, C), (1, 0, 2))

    return _unfold(res_p), _unfold(trend_p)


def _reference(x, kernel_size):
    # Pure-JAX reference mirroring the PyTorch code.
    pad = (kernel_size - 1) // 2
    front = jnp.repeat(x[:, 0:1, :], pad, axis=1)
    end = jnp.repeat(x[:, -1:, :], pad, axis=1)
    xp = jnp.concatenate([front, x, end], axis=1)
    windows = jnp.stack(
        [xp[:, j:j + x.shape[1], :] for j in range(kernel_size)], axis=0)
    trend = jnp.mean(windows, axis=0)
    return x - trend, trend


def _check_case(key, shape, kernel_size, atol, rtol):
    x = jax.random.normal(key, shape, dtype=jnp.float32)
    res, trend = series_decomp(x, kernel_size)
    jax.block_until_ready((res, trend))
    res_ref, trend_ref = _reference(x, kernel_size)
    assert res.shape == x.shape and trend.shape == x.shape
    assert jnp.allclose(trend, trend_ref, atol=atol, rtol=rtol)
    assert jnp.allclose(res, res_ref, atol=atol, rtol=rtol)


if __name__ == "__main__":
    root = jax.random.PRNGKey(0)
    k1, k2, k3, k4 = jax.random.split(root, 4)

    # 1) Small unaligned C -> folded-lane path, tap kernel.
    _check_case(k1, (2, 16, 32), 5, atol=1e-5, rtol=1e-5)

    # 2) Channel-aligned C -> native zero-copy path, tap kernel.
    _check_case(k2, (2, 16, 128), 5, atol=1e-5, rtol=1e-5)

    # 3) Small C, kernel_size >= 9 -> folded-lane path, MXU banded-matrix
    #    kernel (looser tolerance: MXU f32 matmul precision).
    _check_case(k3, (2, 24, 16), 9, atol=2e-3, rtol=2e-3)

    # 4) Channel-aligned C, kernel_size >= 9 -> native path, MXU kernel.
    _check_case(k4, (2, 16, 128), 9, atol=2e-3, rtol=2e-3)

    print("KERNEL_OK")
</pallas_src>

<mosaic_0001>
module attributes {stable_mosaic.version = 11 : i64} {
  func.func @_decomp_taps_kernel(%arg0: i32, %arg1: memref<16x128xf32, #tpu.memory_space<vmem>>, %arg2: memref<16x128xf32, #tpu.memory_space<vmem>>, %arg3: memref<16x128xf32, #tpu.memory_space<vmem>>) attributes {dimension_semantics = [#tpu.dimension_semantics<parallel>], iteration_bounds = array<i64: 1>, scalar_prefetch = 0 : i64, scratch_operands = 0 : i64, tpu.core_type = #tpu.core_type<tc>, window_params = [{transform_indices = @transform_0, window_bounds = array<i64: 16, 128>}, {transform_indices = @transform_1, window_bounds = array<i64: 16, 128>}, {transform_indices = @transform_2, window_bounds = array<i64: 16, 128>}]} {
    %c0 = arith.constant 0 : index
    %c0_0 = arith.constant 0 : index
    %0 = vector.load %arg1[%c0, %c0_0] : memref<16x128xf32, #tpu.memory_space<vmem>>, vector<16x128xf32>
    %1 = vector.extract_strided_slice %0 {offsets = [0, 0], sizes = [1, 128], strides = [1, 1]} : vector<16x128xf32> to vector<1x128xf32>
    %2 = vector.extract_strided_slice %0 {offsets = [15, 0], sizes = [1, 128], strides = [1, 1]} : vector<16x128xf32> to vector<1x128xf32>
    %3 = tpu.iota {dimensions = array<i32: 0>} : vector<16x1xi32>
    %c2_i32 = arith.constant 2 : i32
    %4 = tpu.dynamic_rotate %0 by %c2_i32 dim 0 : vector<16x128xf32>, i32 -> vector<16x128xf32>
    %c2_i32_1 = arith.constant 2 : i32
    %5 = vector.broadcast %c2_i32_1 : i32 to vector<16x1xi32>
    %6 = arith.cmpi slt, %3, %5 : vector<16x1xi32>
    %7 = vector.shape_cast %6 : vector<16x1xi1> to vector<16x1xi1>
    %8 = vector.broadcast %7 : vector<16x1xi1> to vector<16x128xi1>
    %9 = vector.shape_cast %1 : vector<1x128xf32> to vector<1x128xf32>
    %10 = vector.broadcast %9 : vector<1x128xf32> to vector<16x128xf32>
    %11 = arith.select %8, %10, %4 : vector<16x128xi1>, vector<16x128xf32>
    %c1_i32 = arith.constant 1 : i32
    %12 = tpu.dynamic_rotate %0 by %c1_i32 dim 0 : vector<16x128xf32>, i32 -> vector<16x128xf32>
    %c1_i32_2 = arith.constant 1 : i32
    %13 = vector.broadcast %c1_i32_2 : i32 to vector<16x1xi32>
    %14 = arith.cmpi slt, %3, %13 : vector<16x1xi32>
    %15 = vector.shape_cast %14 : vector<16x1xi1> to vector<16x1xi1>
    %16 = vector.broadcast %15 : vector<16x1xi1> to vector<16x128xi1>
    %17 = vector.shape_cast %1 : vector<1x128xf32> to vector<1x128xf32>
    %18 = vector.broadcast %17 : vector<1x128xf32> to vector<16x128xf32>
    %19 = arith.select %16, %18, %12 : vector<16x128xi1>, vector<16x128xf32>
    %c15_i32 = arith.constant 15 : i32
    %20 = tpu.dynamic_rotate %0 by %c15_i32 dim 0 : vector<16x128xf32>, i32 -> vector<16x128xf32>
    %c15_i32_3 = arith.constant 15 : i32
    %21 = vector.broadcast %c15_i32_3 : i32 to vector<16x1xi32>
    %22 = arith.cmpi sge, %3, %21 : vector<16x1xi32>
    %23 = vector.shape_cast %22 : vector<16x1xi1> to vector<16x1xi1>
    %24 = vector.broadcast %23 : vector<16x1xi1> to vector<16x128xi1>
    %25 = vector.shape_cast %2 : vector<1x128xf32> to vector<1x128xf32>
    %26 = vector.broadcast %25 : vector<1x128xf32> to vector<16x128xf32>
    %27 = arith.select %24, %26, %20 : vector<16x128xi1>, vector<16x128xf32>
    %c14_i32 = arith.constant 14 : i32
    %28 = tpu.dynamic_rotate %0 by %c14_i32 dim 0 : vector<16x128xf32>, i32 -> vector<16x128xf32>
    %c14_i32_4 = arith.constant 14 : i32
    %29 = vector.broadcast %c14_i32_4 : i32 to vector<16x1xi32>
    %30 = arith.cmpi sge, %3, %29 : vector<16x1xi32>
    %31 = vector.shape_cast %30 : vector<16x1xi1> to vector<16x1xi1>
    %32 = vector.broadcast %31 : vector<16x1xi1> to vector<16x128xi1>
    %33 = vector.shape_cast %2 : vector<1x128xf32> to vector<1x128xf32>
    %34 = vector.broadcast %33 : vector<1x128xf32> to vector<16x128xf32>
    %35 = arith.select %32, %34, %28 : vector<16x128xi1>, vector<16x128xf32>
    %36 = arith.addf %11, %35 : vector<16x128xf32>
    %37 = arith.addf %36, %19 : vector<16x128xf32>
    %38 = arith.addf %37, %0 : vector<16x128xf32>
    %39 = arith.addf %38, %27 : vector<16x128xf32>
    %cst = arith.constant 2.000000e-01 : f32
    %40 = vector.broadcast %cst : f32 to vector<16x128xf32>
    %41 = arith.mulf %39, %40 : vector<16x128xf32>
    %c0_5 = arith.constant 0 : index
    %c0_6 = arith.constant 0 : index
    %42 = vector.load %arg3[%c0_5, %c0_6] : memref<16x128xf32, #tpu.memory_space<vmem>>, vector<16x128xf32>
    tpu.vector_store %arg3[%c0_5, %c0_6], %41 {strides = array<i32>} : memref<16x128xf32, #tpu.memory_space<vmem>>, vector<16x128xf32>,
    %43 = arith.subf %0, %41 : vector<16x128xf32>
    %c0_7 = arith.constant 0 : index
    %c0_8 = arith.constant 0 : index
    %44 = vector.load %arg2[%c0_7, %c0_8] : memref<16x128xf32, #tpu.memory_space<vmem>>, vector<16x128xf32>
    tpu.vector_store %arg2[%c0_7, %c0_8], %43 {strides = array<i32>} : memref<16x128xf32, #tpu.memory_space<vmem>>, vector<16x128xf32>,
    return
  }
  func.func @transform_0(%arg0: i32) -> (i32, i32) {
    %c0_i32 = arith.constant 0 : i32
    %c0_i32_0 = arith.constant 0 : i32
    return %c0_i32, %arg0 : i32, i32
  }
  func.func @transform_1(%arg0: i32) -> (i32, i32) {
    %c0_i32 = arith.constant 0 : i32
    %c0_i32_0 = arith.constant 0 : i32
    return %c0_i32, %arg0 : i32, i32
  }
  func.func @transform_2(%arg0: i32) -> (i32, i32) {
    %c0_i32 = arith.constant 0 : i32
    %c0_i32_0 = arith.constant 0 : i32
    return %c0_i32, %arg0 : i32, i32
  }
}

</mosaic_0001>

<bundles_post_ra>
// kernel: tpu_custom_call.1
= control target key start
LH: loop header
LB: loop body
LE: loop exit
PB: predicated region body
PF: predicated region fallthrough
CT: control target
= control target key end

     0   :  { %8 = vsyncpa [#allocation3], 0  ;;  %s255_s0 = inlined_call_operand.hbm [shape: f32[16,128], index: 0, kind: input, shape index: {}]   ;;  %s256_s1 = inlined_call_operand.hbm [shape: f32[16,128], index: 1, kind: output, shape index: {0}]   ;;  %s257_s2 = inlined_call_operand.hbm [shape: f32[16,128], index: 2, kind: output, shape index: {1}]  }
   0x1   :  { %9 = vsyncpa [#allocation4], 0 }
   0x2   :  { %10 = vsyncpa [#allocation7], 0  ;;  %s209_s9 = smov [#allocation2]  }
   0x3   :  { %s16_s10 = sshll.u32 %s209_s9, 4  ;;  %s17_s10 = int_to_ptr.vmem [resolvable:$true] %s16_s10 }
   0x4   :  { %s151_s11 = scalar_lea.vmem %s17_s10, 256  ;;  %p156_p1 = scmp.lt.s32.totalorder %s17_s10, %s17_s10 }
   0x5   :  { %p152_p0 = scmp.ne.s32.totalorder %s17_s10, %s151_s11  ;;  %p157_p2 = scmp.lt.s32.totalorder %s151_s11, %s151_s11 }
   0x7   :  { %p158_p3 = por %p157_p2, %p156_p1 }
   0x9   :  { %p159_p4 = pnand %p158_p3, %p152_p0 }
   0xb   :  { %162 = shalt.err (!%p159_p4)
}
   0xc   :  { %s210_s12 = smov 128   ;;  %s211_s13 = smov 8  }
   0xd   :  { %22 = dma.hbm_to_vmem [thread:$0]  %s255_s0, 256, %s17_s10, [#allocation3], %s210_s12, %s210_s12, %s211_s13  }
   0xe   :  { %203 = dma.done.wait [#allocation3], 256  }
   0xf   :  { %204 = vsyncadd [#allocation3], 4294967040  ;;  %v28_v0 = vlaneseq  ;;  %v26_v5 = vld [vmem:[#allocation2] sm:$0xff]  ;;  %v27_v6 = vld [vmem:[#allocation2 + $0x8] sm:$0xff]  ;;  %s212_s0 = smov [#allocation6]   ;;  %s213_s17 = smov [#allocation5]  }
  0x10   :  { %v31_v7 = vrot.slane %v26_v5, 6  ;;  %v32_v8 = vrot.slane %v27_v6, 6  ;;  %v47_v10 = vrot.slane %v26_v5, 7  ;;  %v48_v11 = vrot.slane %v27_v6, 7  ;;  %s122_s16 = sshll.u32 %s212_s0, 4  ;;  %s110_s18 = sshll.u32 %s213_s17, 4  ;;  %s123_s16 = int_to_ptr.vmem [resolvable:$true] %s122_s16  ;;  %s111_s18 = int_to_ptr.vmem [resolvable:$true] %s110_s18 }
  0x11   :  { %v29_v1 = vshrl.u32 %v28_v0, 7  ;;  %v59_v12 = vrot.slane %v26_v5, 1  ;;  %v76_v13 = vrot.slane %v26_v5, 2  ;;  %v60_v15 = vrot.slane %v27_v6, 1  ;;  %s163_s19 = scalar_lea.vmem %s123_s16, 256  ;;  %p168_p6 = scmp.lt.s32.totalorder %s123_s16, %s123_s16 }
  0x12   :  { %v77_v16 = vrot.slane %v27_v6, 2  ;;  %p164_p5 = scmp.ne.s32.totalorder %s123_s16, %s163_s19  ;;  %p169_p7 = scmp.lt.s32.totalorder %s163_s19, %s163_s19 }
  0x13   :  { %v43_v2 = vsub.s32 0, %v29_v1  ;;  %v30_v3 = vadd.s32 8, %v29_v1  ;;  %v72_v4 = vsub.s32 7, %v29_v1  ;;  %vm33_vm0 = vcmp.lt.s32.totalorder %v29_v1, 2 }
  0x14   :  { %vm49_vm1 = vcmp.lt.s32.totalorder %v29_v1, 1  ;;  %vm78_vm2 = vcmp.lt.s32.totalorder %v29_v1, 6  ;;  %v35_v14 = vsel %vm33_vm0, %v32_v8, %v31_v7  ;;  %vm61_vm4 = vcmp.lt.s32.totalorder %v29_v1, 7  ;;  %p170_p8 = por %p169_p7, %p168_p6 }
  0x15   :  { %v44_v9 = vrot.slane %v26_v5, %v43_v2  ;;  %vm82_vm3 = vcmp.ge.s32.totalorder %v30_v3, 14  ;;  %v73_v17 = vrot.slane %v27_v6, %v72_v4  ;;  %v51_v19 = vsel %vm49_vm1, %v48_v11, %v47_v10 }
  0x16   :  { %v34_v20 = vsel %vm33_vm0, %v31_v7, %v32_v8  ;;  %v79_v22 = vsel %vm78_vm2, %v76_v13, %v77_v16  ;;  %v80_v23 = vsel %vm78_vm2, %v77_v16, %v76_v13  ;;  %v50_v25 = vsel %vm49_vm1, %v47_v10, %v48_v11  ;;  %p171_p9 = pnand %p170_p8, %p164_p5 }
  0x17   :  { %v45_v18 = vsel %vm33_vm0, %v44_v9, %v35_v14  ;;  %v57_v21 = vsel %vm49_vm1, %v44_v9, %v51_v19  ;;  %v88_v26 = vsel %vm82_vm3, %v73_v17, %v80_v23  ;;  %v63_v27 = vsel %vm61_vm4, %v60_v15, %v59_v12 }
  0x18   :  { %v89_v24 = vadd.f32 %v79_v22, %v45_v18  ;;  %vm65_vm5 = vcmp.ge.s32.totalorder %v30_v3, 15  ;;  %v90_v28 = vadd.f32 %v88_v26, %v34_v20  ;;  %v62_v30 = vsel %vm61_vm4, %v59_v12, %v60_v15 }
  0x19   :  { %v75_v33 = vsel %vm65_vm5, %v73_v17, %v63_v27 }
  0x1a   :  { %v91_v29 = vadd.f32 %v89_v24, %v57_v21  ;;  %v92_v31 = vadd.f32 %v90_v28, %v50_v25 }
  0x1c   :  { %v93_v32 = vadd.f32 %v91_v29, %v26_v5  ;;  %v94_v34 = vadd.f32 %v92_v31, %v27_v6 }
  0x1e   :  { %v95_v35 = vadd.f32 %v93_v32, %v62_v30  ;;  %v96_v36 = vadd.f32 %v94_v34, %v75_v33 }
  0x20   :  { %v97_v37 = vmul.f32 0.2, %v95_v35  ;;  %v98_v38 = vmul.f32 0.2, %v96_v36 }
  0x22   :  { %99 = vst [vmem:[#allocation6] sm:$0xff] %v97_v37  ;;  %v101_v39 = vsub.f32 %v26_v5, %v97_v37  ;;  %100 = vst [vmem:[#allocation6 + $0x8] sm:$0xff] %v98_v38  ;;  %v102_v40 = vsub.f32 %v27_v6, %v98_v38 }
  0x24   :  { %103 = vst [vmem:[#allocation5] sm:$0xff] %v101_v39 }
  0x25   :  { %174 = shalt.err (!%p171_p9)
}
  0x26   :  { %128 = dma.vmem_to_hbm [thread:$0]  %s123_s16, 256, %s257_s2, [#allocation7], %s210_s12, %s210_s12, %s211_s13   ;;  %104 = vst [vmem:[#allocation5 + $0x8] sm:$0xff] %v102_v40 }
  0x27   :  { %s183_s22 = scalar_lea.vmem %s111_s18, 256  ;;  %p188_p11 = scmp.lt.s32.totalorder %s111_s18, %s111_s18 }
  0x28   :  { %p184_p10 = scmp.ne.s32.totalorder %s111_s18, %s183_s22  ;;  %p189_p12 = scmp.lt.s32.totalorder %s183_s22, %s183_s22 }
  0x2a   :  { %p190_p13 = por %p189_p12, %p188_p11 }
  0x2c   :  { %p191_p0 = pnand %p190_p13, %p184_p10 }
  0x2e   :  { %194 = shalt.err (!%p191_p0)
}
  0x2f   :  { %116 = dma.vmem_to_hbm [thread:$0]  %s111_s18, 256, %s256_s1, [#allocation4], %s210_s12, %s210_s12, %s211_s13  }
  0x30   :  { %205 = dma.done.wait [#allocation4], 256  }
  0x31   :  { %206 = vsyncadd [#allocation4], 4294967040 }
  0x32   :  { %207 = dma.done.wait [#allocation7], 256  }
  0x33   :  { %208 = vsyncadd [#allocation7], 4294967040 }
  0x34   :  { %135 = vsyncpa [#allocation3], 1 }
  0x35   :  { %136 = vsyncpa [#allocation4], 1 }
  0x36   :  { %137 = vsyncpa [#allocation7], 1 }

</bundles_post_ra>
